<compile_context>
chip_gen: v5e
topology: v5e:2x2
jax: 0.10.0
libtpu: 0.0.40
codegen_flags: <defaults>
</compile_context>

<pallas_src>
import functools

import jax
import jax.numpy as jnp
from jax.experimental import pallas as pl
from jax.experimental.pallas import tpu as pltpu


def _make_mlp_kernel(num_hidden_layers: int,
                     negative_slope: float = 0.01,
                     compute_dtype=jnp.bfloat16):
    """kernel: x row-tile -> [Linear + leaky_relu] * L -> Linear -> out tile."""
    # leaky_relu as jnp.maximum(h, s*h) is only valid for 0 <= s < 1.
    assert 0.0 <= negative_slope < 1.0, "negative_slope must be in [0, 1)"

    def kernel(*refs):
        x_ref = refs[0]
        out_ref = refs[-1]
        params = refs[1:-1]  # (w0, b0, w1, b1, ..., w_out, b_out)

        h = x_ref[...]  # f32 activations; cast to compute_dtype only at dots
        for li in range(num_hidden_layers):
            w = params[2 * li][...]           # compute_dtype (bf16 or f32)
            b = params[2 * li + 1][...]       # f32
            h = jnp.dot(h.astype(compute_dtype), w,
                        preferred_element_type=jnp.float32) + b
            # leaky_relu as a single max (slope < 1): saves the cmp+select pair
            h = jnp.maximum(h, negative_slope * h)
        w_out = params[2 * num_hidden_layers][...]
        b_out = params[2 * num_hidden_layers + 1][...]
        o = jnp.dot(h.astype(compute_dtype), w_out,
                    preferred_element_type=jnp.float32) + b_out
        out_ref[...] = o.astype(out_ref.dtype)

    return kernel


def init_mlp_params(key, input_dim, output_dim, hidden_dim=256, hidden_layers=4):
    """nn.Linear-style init (U[-1/sqrt(fan_in), 1/sqrt(fan_in)]).

    Weights stored as (in_features, out_features) so the kernel computes x @ W.
    """
    dims_in = [input_dim] + [hidden_dim] * (hidden_layers - 1) + [hidden_dim]
    dims_out = [hidden_dim] * hidden_layers + [output_dim]
    params = []
    for fan_in, fan_out in zip(dims_in, dims_out):
        key, kw, kb = jax.random.split(key, 3)
        bound = 1.0 / jnp.sqrt(jnp.float32(fan_in))
        w = jax.random.uniform(kw, (fan_in, fan_out), jnp.float32, -bound, bound)
        # bias kept 2-D (1, fan_out) so it broadcasts cleanly on lanes
        b = jax.random.uniform(kb, (1, fan_out), jnp.float32, -bound, bound)
        params.append((w, b))
    return params


@functools.partial(jax.jit, static_argnames=("hidden_layers", "tile_m", "use_bf16"))
def mlp_forward(x, params_flat, *, hidden_layers, tile_m=4096, use_bf16=True):
    """x: (batch, N_v, input_dim) f32 -> (batch, N_v, output_dim) f32."""
    batch, n_v, input_dim = x.shape
    output_dim = params_flat[-1].shape[-1]
    m = batch * n_v
    x2d = x.reshape(m, input_dim)  # metadata-only reshape, no HBM copy

    compute_dtype = jnp.bfloat16 if use_bf16 else jnp.float32

    # Weights cast once in the wrapper (halves weight DMA on the bf16 path);
    # biases stay f32 for the VPU add.  No output padding anymore.
    proc_params = []
    for li in range(hidden_layers):
        proc_params.append(params_flat[2 * li].astype(compute_dtype))    # weight
        proc_params.append(params_flat[2 * li + 1].astype(jnp.float32))  # bias
    proc_params.append(params_flat[-2].astype(compute_dtype))            # w_out
    proc_params.append(params_flat[-1].astype(jnp.float32))              # b_out
    proc_params = tuple(proc_params)

    # Row tile: big (amortizes ~0.35us/step overhead, MXU-friendly), sublane
    # aligned, clamped so grid_m >= 2 whenever m > 8 (feeds both v7x TCs).
    tile = min(tile_m, pl.cdiv(m, 8) * 8)
    if m > 8:
        tile = min(tile, pl.cdiv(pl.cdiv(m, 2), 8) * 8)
    tile = max(8, (tile // 8) * 8)
    grid_m = pl.cdiv(m, tile)  # no input pre-pad; Pallas clips the edge block

    kernel = _make_mlp_kernel(hidden_layers, compute_dtype=compute_dtype)

    x_spec = pl.BlockSpec((tile, input_dim), lambda i: (i, 0))
    # Constant index_map -> params stay VMEM-resident across grid steps.
    param_specs = [pl.BlockSpec(p.shape, lambda i: (0, 0)) for p in proc_params]
    out_spec = pl.BlockSpec((tile, output_dim), lambda i: (i, 0))

    out2d = pl.pallas_call(
        kernel,
        out_shape=jax.ShapeDtypeStruct((m, output_dim), jnp.float32),
        grid_spec=pltpu.PrefetchScalarGridSpec(
            num_scalar_prefetch=0,
            grid=(grid_m,),
            in_specs=[x_spec] + param_specs,
            out_specs=out_spec,
        ),
        compiler_params=pltpu.CompilerParams(
            # Row axis is embarrassingly parallel -> shards across v7x's 2 TCs.
            dimension_semantics=("parallel",),
            # Above v5e/v6e default scoped limits, below v7x's 64 MiB physical.
            vmem_limit_bytes=48 * 1024 * 1024,
        ),
    )(x2d, *proc_params)

    return out2d.reshape(batch, n_v, output_dim)  # metadata-only reshape


def _ref_forward(x, params, hidden_layers, negative_slope=0.01):
    """Pure-JAX f32 reference (same math as the PyTorch module)."""
    batch, n_v, input_dim = x.shape
    h = x.reshape(batch * n_v, input_dim)
    for li in range(hidden_layers):
        w, b = params[li]
        h = h @ w + b
        h = jnp.where(h > 0.0, h, negative_slope * h)
    w, b = params[-1]
    out = h @ w + b
    return out.reshape(batch, n_v, -1)


if __name__ == "__main__":
    # Small shapes consistent with forward(input: (batch, N_v, input_dim)).
    batch, n_v, input_dim = 2, 8, 16
    hidden_dim, hidden_layers, output_dim = 32, 4, 8

    key = jax.random.PRNGKey(0)
    key, kx = jax.random.split(key)
    x = jax.random.normal(kx, (batch, n_v, input_dim), jnp.float32)

    params = init_mlp_params(
        key, input_dim, output_dim, hidden_dim=hidden_dim, hidden_layers=hidden_layers
    )
    params_flat = tuple(t for wb in params for t in wb)

    # NOTE: dropout_rate in the PyTorch __init__ is unused in its forward(),
    # so there is nothing to implement for it.
    ref = _ref_forward(x, params, hidden_layers)

    # Default bf16-operand fast path (f32 accumulation): loose tolerance.
    out_bf16 = mlp_forward(x, params_flat, hidden_layers=hidden_layers)
    jax.block_until_ready(out_bf16)
    assert out_bf16.shape == (batch, n_v, output_dim)
    assert jnp.allclose(out_bf16, ref, atol=5e-2, rtol=5e-2)

    # Pure-f32 path: must match the reference closely.
    out_f32 = mlp_forward(x, params_flat, hidden_layers=hidden_layers, use_bf16=False)
    jax.block_until_ready(out_f32)
    assert jnp.allclose(out_f32, ref, atol=1e-4, rtol=1e-4)

    # Edge-block test: m = batch * n_v = 14 is not a multiple of the 8-row
    # sublane tile -> exercises Pallas partial-block clipping on input/output.
    key, kx2 = jax.random.split(key)
    x_odd = jax.random.normal(kx2, (batch, 7, input_dim), jnp.float32)
    ref_odd = _ref_forward(x_odd, params, hidden_layers)
    out_odd = mlp_forward(x_odd, params_flat, hidden_layers=hidden_layers,
                          use_bf16=False)
    jax.block_until_ready(out_odd)
    assert out_odd.shape == (batch, 7, output_dim)
    assert jnp.allclose(out_odd, ref_odd, atol=1e-4, rtol=1e-4)

    print("KERNEL_OK")
</pallas_src>

<mosaic_0001>
module attributes {stable_mosaic.version = 11 : i64} {
  func.func @kernel(%arg0: i32, %arg1: memref<8x16xf32, #tpu.memory_space<vmem>>, %arg2: memref<16x32xbf16, #tpu.memory_space<vmem>>, %arg3: memref<1x32xf32, #tpu.memory_space<vmem>>, %arg4: memref<32x32xbf16, #tpu.memory_space<vmem>>, %arg5: memref<1x32xf32, #tpu.memory_space<vmem>>, %arg6: memref<32x32xbf16, #tpu.memory_space<vmem>>, %arg7: memref<1x32xf32, #tpu.memory_space<vmem>>, %arg8: memref<32x32xbf16, #tpu.memory_space<vmem>>, %arg9: memref<1x32xf32, #tpu.memory_space<vmem>>, %arg10: memref<32x8xbf16, #tpu.memory_space<vmem>>, %arg11: memref<1x8xf32, #tpu.memory_space<vmem>>, %arg12: memref<8x8xf32, #tpu.memory_space<vmem>>) attributes {dimension_semantics = [#tpu.dimension_semantics<parallel>], iteration_bounds = array<i64: 2>, scalar_prefetch = 0 : i64, scratch_operands = 0 : i64, tpu.core_type = #tpu.core_type<tc>, window_params = [{transform_indices = @transform_0, window_bounds = array<i64: 8, 16>}, {pipeline_mode = #tpu.pipeline_mode<synchronous>, transform_indices = @transform_1, window_bounds = array<i64: 16, 32>}, {pipeline_mode = #tpu.pipeline_mode<synchronous>, transform_indices = @transform_2, window_bounds = array<i64: 1, 32>}, {pipeline_mode = #tpu.pipeline_mode<synchronous>, transform_indices = @transform_3, window_bounds = array<i64: 32, 32>}, {pipeline_mode = #tpu.pipeline_mode<synchronous>, transform_indices = @transform_4, window_bounds = array<i64: 1, 32>}, {pipeline_mode = #tpu.pipeline_mode<synchronous>, transform_indices = @transform_5, window_bounds = array<i64: 32, 32>}, {pipeline_mode = #tpu.pipeline_mode<synchronous>, transform_indices = @transform_6, window_bounds = array<i64: 1, 32>}, {pipeline_mode = #tpu.pipeline_mode<synchronous>, transform_indices = @transform_7, window_bounds = array<i64: 32, 32>}, {pipeline_mode = #tpu.pipeline_mode<synchronous>, transform_indices = @transform_8, window_bounds = array<i64: 1, 32>}, {pipeline_mode = #tpu.pipeline_mode<synchronous>, transform_indices = @transform_9, window_bounds = array<i64: 32, 8>}, {pipeline_mode = #tpu.pipeline_mode<synchronous>, transform_indices = @transform_10, window_bounds = array<i64: 1, 8>}, {transform_indices = @transform_11, window_bounds = array<i64: 8, 8>}]} {
    %c0 = arith.constant 0 : index
    %c0_0 = arith.constant 0 : index
    %0 = vector.load %arg1[%c0, %c0_0] : memref<8x16xf32, #tpu.memory_space<vmem>>, vector<8x16xf32>
    %c0_1 = arith.constant 0 : index
    %c0_2 = arith.constant 0 : index
    %1 = vector.load %arg2[%c0_1, %c0_2] : memref<16x32xbf16, #tpu.memory_space<vmem>>, vector<16x32xbf16>
    %c0_3 = arith.constant 0 : index
    %c0_4 = arith.constant 0 : index
    %2 = vector.load %arg3[%c0_3, %c0_4] : memref<1x32xf32, #tpu.memory_space<vmem>>, vector<1x32xf32>
    %3 = arith.truncf %0 : vector<8x16xf32> to vector<8x16xbf16>
    %cst = arith.constant dense<0.000000e+00> : vector<8x32xf32>
    %4 = tpu.matmul %3, %1, %cst {dimension_numbers = #tpu.dot_dimension_numbers<[1], [0], [0], [1], [0, 0, 1, 1], [], []>} : vector<8x16xbf16>, vector<16x32xbf16>, vector<8x32xf32> -> vector<8x32xf32>
    %5 = vector.broadcast %2 : vector<1x32xf32> to vector<8x32xf32>
    %6 = arith.addf %4, %5 : vector<8x32xf32>
    %cst_5 = arith.constant 0.00999999977 : f32
    %7 = vector.broadcast %cst_5 : f32 to vector<8x32xf32>
    %8 = arith.mulf %7, %6 : vector<8x32xf32>
    %9 = arith.maximumf %6, %8 : vector<8x32xf32>
    %c0_6 = arith.constant 0 : index
    %c0_7 = arith.constant 0 : index
    %10 = vector.load %arg4[%c0_6, %c0_7] : memref<32x32xbf16, #tpu.memory_space<vmem>>, vector<32x32xbf16>
    %c0_8 = arith.constant 0 : index
    %c0_9 = arith.constant 0 : index
    %11 = vector.load %arg5[%c0_8, %c0_9] : memref<1x32xf32, #tpu.memory_space<vmem>>, vector<1x32xf32>
    %12 = arith.truncf %9 : vector<8x32xf32> to vector<8x32xbf16>
    %cst_10 = arith.constant dense<0.000000e+00> : vector<8x32xf32>
    %13 = tpu.matmul %12, %10, %cst_10 {dimension_numbers = #tpu.dot_dimension_numbers<[1], [0], [0], [1], [0, 0, 1, 1], [], []>} : vector<8x32xbf16>, vector<32x32xbf16>, vector<8x32xf32> -> vector<8x32xf32>
    %14 = vector.broadcast %11 : vector<1x32xf32> to vector<8x32xf32>
    %15 = arith.addf %13, %14 : vector<8x32xf32>
    %cst_11 = arith.constant 0.00999999977 : f32
    %16 = vector.broadcast %cst_11 : f32 to vector<8x32xf32>
    %17 = arith.mulf %16, %15 : vector<8x32xf32>
    %18 = arith.maximumf %15, %17 : vector<8x32xf32>
    %c0_12 = arith.constant 0 : index
    %c0_13 = arith.constant 0 : index
    %19 = vector.load %arg6[%c0_12, %c0_13] : memref<32x32xbf16, #tpu.memory_space<vmem>>, vector<32x32xbf16>
    %c0_14 = arith.constant 0 : index
    %c0_15 = arith.constant 0 : index
    %20 = vector.load %arg7[%c0_14, %c0_15] : memref<1x32xf32, #tpu.memory_space<vmem>>, vector<1x32xf32>
    %21 = arith.truncf %18 : vector<8x32xf32> to vector<8x32xbf16>
    %cst_16 = arith.constant dense<0.000000e+00> : vector<8x32xf32>
    %22 = tpu.matmul %21, %19, %cst_16 {dimension_numbers = #tpu.dot_dimension_numbers<[1], [0], [0], [1], [0, 0, 1, 1], [], []>} : vector<8x32xbf16>, vector<32x32xbf16>, vector<8x32xf32> -> vector<8x32xf32>
    %23 = vector.broadcast %20 : vector<1x32xf32> to vector<8x32xf32>
    %24 = arith.addf %22, %23 : vector<8x32xf32>
    %cst_17 = arith.constant 0.00999999977 : f32
    %25 = vector.broadcast %cst_17 : f32 to vector<8x32xf32>
    %26 = arith.mulf %25, %24 : vector<8x32xf32>
    %27 = arith.maximumf %24, %26 : vector<8x32xf32>
    %c0_18 = arith.constant 0 : index
    %c0_19 = arith.constant 0 : index
    %28 = vector.load %arg8[%c0_18, %c0_19] : memref<32x32xbf16, #tpu.memory_space<vmem>>, vector<32x32xbf16>
    %c0_20 = arith.constant 0 : index
    %c0_21 = arith.constant 0 : index
    %29 = vector.load %arg9[%c0_20, %c0_21] : memref<1x32xf32, #tpu.memory_space<vmem>>, vector<1x32xf32>
    %30 = arith.truncf %27 : vector<8x32xf32> to vector<8x32xbf16>
    %cst_22 = arith.constant dense<0.000000e+00> : vector<8x32xf32>
    %31 = tpu.matmul %30, %28, %cst_22 {dimension_numbers = #tpu.dot_dimension_numbers<[1], [0], [0], [1], [0, 0, 1, 1], [], []>} : vector<8x32xbf16>, vector<32x32xbf16>, vector<8x32xf32> -> vector<8x32xf32>
    %32 = vector.broadcast %29 : vector<1x32xf32> to vector<8x32xf32>
    %33 = arith.addf %31, %32 : vector<8x32xf32>
    %cst_23 = arith.constant 0.00999999977 : f32
    %34 = vector.broadcast %cst_23 : f32 to vector<8x32xf32>
    %35 = arith.mulf %34, %33 : vector<8x32xf32>
    %36 = arith.maximumf %33, %35 : vector<8x32xf32>
    %c0_24 = arith.constant 0 : index
    %c0_25 = arith.constant 0 : index
    %37 = vector.load %arg10[%c0_24, %c0_25] : memref<32x8xbf16, #tpu.memory_space<vmem>>, vector<32x8xbf16>
    %c0_26 = arith.constant 0 : index
    %c0_27 = arith.constant 0 : index
    %38 = vector.load %arg11[%c0_26, %c0_27] : memref<1x8xf32, #tpu.memory_space<vmem>>, vector<1x8xf32>
    %39 = arith.truncf %36 : vector<8x32xf32> to vector<8x32xbf16>
    %cst_28 = arith.constant dense<0.000000e+00> : vector<8x8xf32>
    %40 = tpu.matmul %39, %37, %cst_28 {dimension_numbers = #tpu.dot_dimension_numbers<[1], [0], [0], [1], [0, 0, 1, 1], [], []>} : vector<8x32xbf16>, vector<32x8xbf16>, vector<8x8xf32> -> vector<8x8xf32>
    %41 = vector.broadcast %38 : vector<1x8xf32> to vector<8x8xf32>
    %42 = arith.addf %40, %41 : vector<8x8xf32>
    %c0_29 = arith.constant 0 : index
    %c0_30 = arith.constant 0 : index
    %43 = vector.load %arg12[%c0_29, %c0_30] : memref<8x8xf32, #tpu.memory_space<vmem>>, vector<8x8xf32>
    tpu.vector_store %arg12[%c0_29, %c0_30], %42 {strides = array<i32>} : memref<8x8xf32, #tpu.memory_space<vmem>>, vector<8x8xf32>,
    return
  }
  func.func @transform_0(%arg0: i32) -> (i32, i32) {
    %c0_i32 = arith.constant 0 : i32
    %c0_i32_0 = arith.constant 0 : i32
    return %arg0, %c0_i32 : i32, i32
  }
  func.func @transform_1(%arg0: i32) -> (i32, i32) {
    %c0_i32 = arith.constant 0 : i32
    %c0_i32_0 = arith.constant 0 : i32
    %c0_i32_1 = arith.constant 0 : i32
    return %c0_i32, %c0_i32_0 : i32, i32
  }
  func.func @transform_2(%arg0: i32) -> (i32, i32) {
    %c0_i32 = arith.constant 0 : i32
    %c0_i32_0 = arith.constant 0 : i32
    %c0_i32_1 = arith.constant 0 : i32
    return %c0_i32, %c0_i32_0 : i32, i32
  }
  func.func @transform_3(%arg0: i32) -> (i32, i32) {
    %c0_i32 = arith.constant 0 : i32
    %c0_i32_0 = arith.constant 0 : i32
    %c0_i32_1 = arith.constant 0 : i32
    return %c0_i32, %c0_i32_0 : i32, i32
  }
  func.func @transform_4(%arg0: i32) -> (i32, i32) {
    %c0_i32 = arith.constant 0 : i32
    %c0_i32_0 = arith.constant 0 : i32
    %c0_i32_1 = arith.constant 0 : i32
    return %c0_i32, %c0_i32_0 : i32, i32
  }
  func.func @transform_5(%arg0: i32) -> (i32, i32) {
    %c0_i32 = arith.constant 0 : i32
    %c0_i32_0 = arith.constant 0 : i32
    %c0_i32_1 = arith.constant 0 : i32
    return %c0_i32, %c0_i32_0 : i32, i32
  }
  func.func @transform_6(%arg0: i32) -> (i32, i32) {
    %c0_i32 = arith.constant 0 : i32
    %c0_i32_0 = arith.constant 0 : i32
    %c0_i32_1 = arith.constant 0 : i32
    return %c0_i32, %c0_i32_0 : i32, i32
  }
  func.func @transform_7(%arg0: i32) -> (i32, i32) {
    %c0_i32 = arith.constant 0 : i32
    %c0_i32_0 = arith.constant 0 : i32
    %c0_i32_1 = arith.constant 0 : i32
    return %c0_i32, %c0_i32_0 : i32, i32
  }
  func.func @transform_8(%arg0: i32) -> (i32, i32) {
    %c0_i32 = arith.constant 0 : i32
    %c0_i32_0 = arith.constant 0 : i32
    %c0_i32_1 = arith.constant 0 : i32
    return %c0_i32, %c0_i32_0 : i32, i32
  }
  func.func @transform_9(%arg0: i32) -> (i32, i32) {
    %c0_i32 = arith.constant 0 : i32
    %c0_i32_0 = arith.constant 0 : i32
    %c0_i32_1 = arith.constant 0 : i32
    return %c0_i32, %c0_i32_0 : i32, i32
  }
  func.func @transform_10(%arg0: i32) -> (i32, i32) {
    %c0_i32 = arith.constant 0 : i32
    %c0_i32_0 = arith.constant 0 : i32
    %c0_i32_1 = arith.constant 0 : i32
    return %c0_i32, %c0_i32_0 : i32, i32
  }
  func.func @transform_11(%arg0: i32) -> (i32, i32) {
    %c0_i32 = arith.constant 0 : i32
    %c0_i32_0 = arith.constant 0 : i32
    return %arg0, %c0_i32 : i32, i32
  }
}

</mosaic_0001>

<bundles_post_ra>
// kernel: mlp_forward.1
= control target key start
LH: loop header
LB: loop body
LE: loop exit
PB: predicated region body
PF: predicated region fallthrough
CT: control target
= control target key end

     0   :  { %s1007_s0 = inlined_call_operand.vmem [shape: f32[16,16], index: 0, kind: input, shape index: {}]   ;;  %s1008_s1 = inlined_call_operand.vmem [shape: bf16[16,32], index: 1, kind: input, shape index: {}]   ;;  %s1009_s2 = inlined_call_operand.vmem [shape: f32[1,32], index: 2, kind: input, shape index: {}]   ;;  %s1010_s3 = inlined_call_operand.vmem [shape: bf16[32,32], index: 3, kind: input, shape index: {}]   ;;  %s1011_s4 = inlined_call_operand.vmem [shape: f32[1,32], index: 4, kind: input, shape index: {}]   ;;  %s1012_s5 = inlined_call_operand.vmem [shape: bf16[32,32], index: 5, kind: input, shape index: {}]   ;;  %s1013_s6 = inlined_call_operand.vmem [shape: f32[1,32], index: 6, kind: input, shape index: {}]   ;;  %s1014_s7 = inlined_call_operand.vmem [shape: bf16[32,32], index: 7, kind: input, shape index: {}]   ;;  %s1015_s8 = inlined_call_operand.vmem [shape: f32[1,32], index: 8, kind: input, shape index: {}]   ;;  %s1016_s9 = inlined_call_operand.vmem [shape: bf16[32,8], index: 9, kind: input, shape index: {}]   ;;  %s1017_s10 = inlined_call_operand.vmem [shape: f32[1,8], index: 10, kind: input, shape index: {}]   ;;  %s1018_s11 = inlined_call_operand.hbm [shape: f32[16,8], index: 11, kind: output, shape index: {}]  }
   0x1   :  { %1019 = sst [smem:[#allocation5_spill]] %s1007_s0 }
   0x2   :  { %1020 = sst [smem:[#allocation6_spill]] %s1008_s1 }
   0x3   :  { %1021 = sst [smem:[#allocation7_spill]] %s1009_s2 }
   0x4   :  { %16 = vsyncpa [#allocation3], 0 }
   0x5   :  { %18 = vsyncpa [#allocation3 + $0x1], 0  ;;  %s876_s17 = smov 0   ;;  %s878_s18 = smov 0  }
   0x6   :  { %s880_s19 = smov 0   ;;  %s882_s20 = smov 0  }
   0x7 LB: > { %s897_s21 = sadd.s32 4294967295, %s814_s20   ;;  %s648_s22 = sadd.s32 4294967294, %s814_s20   ;;  %s814_s20 = sphi %s882_s20, %s1030_s20   ;;  %s810_s19 = sphi %s880_s19, %s1029_s19   ;;  %s806_s18 = sphi %s878_s18, %s1028_s18   ;;  %s802_s17 = sphi %s876_s17, %s1027_s17  }
   0x8   : > { %s901_s23 = sadd.s32 1, %s814_s20   ;;  %s267_s24 = sadd.s32 1, %s810_s19 }
   0x9   : > { %s264_s25 = ssub.s32 %s814_s20, %s901_s23  ;;  %p277_p0 = scmp.ne.s32.totalorder %s810_s19, %s806_s18 }
   0xa   : > { %p265_p1 = scmp.eq.s32.totalorder %s264_s25, 0  ;;  %p278_p2 = scmp.eq.s32.totalorder %s897_s21, 1 }
   0xb   : > { %p283_p3 = scmp.ne.s32.totalorder %s806_s18, %s802_s17  ;;  %p284_p4 = scmp.eq.s32.totalorder %s648_s22, 1 }
   0xc   : > { %s912_s26 = scalar_select %p265_p1, %s810_s19, %s267_s24  }
   0xd   : > { %p914_p5 = por %p278_p2, %p277_p0  ;;  %p918_p6 = por %p284_p4, %p283_p3 }
   0xe   : > { %p651_p7 = scmp.ge.s32.totalorder %s814_s20, 1  ;;  %p339_p8 = scmp.lt.s32.totalorder %s814_s20, 3 }
  0x10   : > { %p340_p9 = pnand %p651_p7, %p339_p8 }
  0x11   : > { %s1024_s1 = sld [smem:[#allocation6_spill]] (!%p340_p9)  ;;  %p378_p10 = scmp.lt.s32.totalorder (!%p340_p9), %s897_s21, 1 }
  0x12   : > { %343 = sbr.rel (%p340_p9) target bundleno = 712 (0x2c8), region = 64  ;;  %s1025_s0 = sld [smem:[#allocation5_spill]] (!%p340_p9) }
  0x13   : > { %s1026_s2 = sld [smem:[#allocation7_spill]] (!%p340_p9)  ;;  %s375_s30 = sand.u32 (!%p340_p9), 1, %s806_s18  }
  0x17   : > { %v699_v0 = vld [vmem:[%s1024_s1] sm:$0xff]  ;;  %s379_s12 = scalar_select %p378_p10, %s897_s21, 1  ;;  %vm397_vm0 = vcmask 130048   ;;  %v701_v3 = vld [vmem:[%s1010_s3 + $0x8] sm:$0xff]  ;;  %vm437_vm1 = vcmask 261120   ;;  %vm571_vm2 = vcmask 64512  }
  0x18   : > { %408 = vmatpush.bf16.msra.mxu0 %v699_v0  ;;  %447 = vmatpush.bf16.msra.mxu1 %v701_v3  ;;  %v700_v4 = vld [vmem:[%s1010_s3] sm:$0xff]  ;;  %v703_v12 = vld [vmem:[%s1012_s5 + $0x8] sm:$0xff] }
  0x19   : > { %s653_s13 = sshll.u32 %s379_s12, 3  ;;  %v747_v5 = vld [vmem:[%s1026_s2] ss:$0 sm:$0xff]  ;;  %486 = vmatpush.bf16.msra.mxu2 %v703_v12  ;;  %v705_v21 = vld [vmem:[%s1014_s7 + $0x8] sm:$0xff]  ;;  %s696_s12 = sshll.u32 %s897_s21, 3 }
  0x1a   : > { %s381_s16 = scalar_lea.vmem %s1025_s0, %s653_s13  ;;  %v702_v13 = vld [vmem:[%s1012_s5] sm:$0xff]  ;;  %525 = vmatpush.bf16.msra.mxu3 %v705_v21  ;;  %v707_v23 = vld [vmem:[%s1016_s9 + $0x8] sm:$0xff]  ;;  %s652_s13 = sshll.u32 %s375_s30, 3 }
  0x1b   : > { %v383_v1 = vld [vmem:[%s381_s16] sm:$0xff]  ;;  %s584_s16 = scalar_lea.hbm %s1018_s11, %s696_s12  ;;  %s377_s25 = scalar_lea.vmem [#allocation2], %s652_s13 }
  0x1c   : > { %v387_v2 = vpack.c.bf16 %v383_v1, %v383_v1  ;;  %448 = vmatpush.bf16.msra.mxu1 %v700_v4  ;;  %v748_v14 = vld [vmem:[%s1011_s4] ss:$0 sm:$0xff]  ;;  %564 = vmatpush.bf16.msrb.mxu0 %v707_v23  ;;  %s586_s29 = sshll.u32 %s377_s25, 4  ;;  %s588_s0 = sshll.u32 %s584_s16, 4  ;;  %s587_s29 = int_to_ptr.vmem [resolvable:$true] %s586_s29  ;;  %s589_s0 = int_to_ptr.hbm [resolvable:$true] %s588_s0 }
  0x1d   : > { %487 = vmatpush.bf16.msra.mxu2 %v702_v13  ;;  %v704_v22 = vld [vmem:[%s1014_s7] sm:$0xff]  ;;  %s574_s21 = scalar_lea.sflag [#allocation3], %s375_s30  ;;  %s766_s1 = sshra.s32 %s589_s0, 4  ;;  %s767_s1 = int_to_ptr.hbm [resolvable:$true] %s766_s1 }
  0x1e   : > { %658 = vmatmul.msk.bf16.vlgmr.msra.gmra.mxu0 %vm397_vm0, %v387_v2  ;;  %526 = vmatpush.bf16.msra.mxu3 %v704_v22  ;;  %v749_v24 = vld [vmem:[%s1013_s6] ss:$0 sm:$0xff]  ;;  %s768_s2 = scalar_lea.hbm %s767_s1, 8  ;;  %s772_s13 = scalar_lea.hbm %s1018_s11, 16 }
  0x1f   : > { %v706_v31 = vld [vmem:[%s1016_s9] sm:$0xff]  ;;  %p769_p11 = scmp.ne.s32.totalorder %s767_s1, %s768_s2  ;;  %p773_p0 = scmp.lt.s32.totalorder %s767_s1, %s1018_s11 }
  0x20   : > { %565 = vmatpush.bf16.msrb.mxu0 %v706_v31  ;;  %v750_v32 = vld [vmem:[%s1015_s8] ss:$0 sm:$0xff]  ;;  %p774_p1 = scmp.lt.s32.totalorder %s772_s13, %s768_s2 }
  0x21   : > { %v751_v39 = vld [vmem:[%s1017_s10] ss:$0 sm:$0xff]  ;;  %p770_p12 = pnand %p769_p11, %p914_p5 }
  0x22   : > { %p775_p2 = por %p774_p1, %p773_p0 }
  0x23   : > { %p771_p13 = pneg %p770_p12 }
  0x25   : > { %p776_p3 = pnand %p775_p2, %p771_p13 }
  0x9b   : > { %v410_v6 = vpop.f32.mrf.mxu0 }
  0x9c   : > { %v411_v7 = vadd.f32 %v747_v5, %v410_v6 }
  0x9e   : > { %v414_v8 = vmul.f32 0.01, %v411_v7 }
  0xa0   : > { %v415_v9 = vmax.f32 %v411_v7, %v414_v8 }
  0xa2   : > { %v421_v10 = vpack.c.bf16 %v415_v9, %v415_v9 }
  0xa3   : > { %v412_v11 = vpop.f32.mrf.mxu0 }
  0xa4   : > { %667 = vmatmul.msk.bf16.vlgmr.msra.gmra.mxu1 %vm437_vm1, %v421_v10 }
 0x121   : > { %v450_v15 = vpop.f32.mrf.mxu1 }
 0x122   : > { %v451_v16 = vadd.f32 %v748_v14, %v450_v15 }
 0x124   : > { %v454_v17 = vmul.f32 0.01, %v451_v16 }
 0x126   : > { %v455_v18 = vmax.f32 %v451_v16, %v454_v17 }
 0x128   : > { %v461_v19 = vpack.c.bf16 %v455_v18, %v455_v18 }
 0x129   : > { %v452_v20 = vpop.f32.mrf.mxu1 }
 0x12a   : > { %676 = vmatmul.msk.bf16.vlgmr.msra.gmra.mxu2 %vm437_vm1, %v461_v19 }
 0x1ad   : > { %v489_v25 = vpop.f32.mrf.mxu2 }
 0x1ae   : > { %v490_v26 = vadd.f32 %v749_v24, %v489_v25 }
 0x1b0   : > { %v493_v27 = vmul.f32 0.01, %v490_v26 }
 0x1b2   : > { %v494_v28 = vmax.f32 %v490_v26, %v493_v27 }
 0x1b4   : > { %v500_v29 = vpack.c.bf16 %v494_v28, %v494_v28 }
 0x1b5   : > { %v491_v30 = vpop.f32.mrf.mxu2 }
 0x1b6   : > { %685 = vmatmul.msk.bf16.vlgmr.msra.gmra.mxu3 %vm437_vm1, %v500_v29 }
 0x239   : > { %v528_v33 = vpop.f32.mrf.mxu3 }
 0x23a   : > { %v529_v34 = vadd.f32 %v750_v32, %v528_v33 }
 0x23c   : > { %v532_v35 = vmul.f32 0.01, %v529_v34 }
 0x23e   : > { %v533_v36 = vmax.f32 %v529_v34, %v532_v35 }
 0x240   : > { %v539_v37 = vpack.c.bf16 %v533_v36, %v533_v36 }
 0x241   : > { %v530_v38 = vpop.f32.mrf.mxu3 }
 0x242   : > { %694 = vmatmul.msk.bf16.vlgmr.msrb.gmra.mxu0 %vm437_vm1, %v539_v37 }
 0x2bf   : > { %v567_v40 = vpop.f32.mrf.mxu0 }
 0x2c0   : > { %v568_v41 = vadd.f32 %v751_v39, %v567_v40 }
 0x2c2   : > { %572 = vst.msk [vmem:[%s377_s25] sm:$0xff] %vm571_vm2, %v568_v41 }
 0x2c3   : > { %779 = shalt.err (!%p776_p3)
}
 0x2c4   : > { %708 = dma.vmem_to_hbm [thread:$0]  (%p914_p5), %s587_s29, 128, %s589_s0, %s574_s21  }
 0x2c7   : > { %v569_v42 = vpop.f32.mrf.mxu0 }
 0x2c8 PF: > { %p714_p4 = scmp.ge.s32.totalorder %s814_s20, 2  ;;  %s600_s30 = sand.u32 1, %s802_s17  }
 0x2c9   : > { %s601_s22 = scalar_lea.sflag [#allocation3], %s600_s30 }
 0x2ca   : > { %p711_p7 = pnand %p714_p4, %p918_p6 }
 0x2cc   : > { %p712_p8 = pneg %p711_p7 }
 0x2ce   : > { %797 = dma.done.wait (%p712_p8), %s601_s22, 128  }
 0x2cf   : > { %799 = vsyncadd (%p712_p8), %s601_s22, 4294967168  ;;  %p21_p9 = scmp.ge.s32.totalorder %s901_s23, 4   ;;  %s1027_s17 = smov %s806_s18 }
 0x2d0   : > { %s1028_s18 = smov %s810_s19  ;;  %s1029_s19 = smov %s912_s26 }
 0x2d1   : > { %s1030_s20 = smov %s901_s23  ;;  %23 = sbr.rel (!%p21_p9) target bundleno = 7 (0x7), region = 99 }
 0x2d6   :  { %607 = vsyncpa [#allocation3], 1 }
 0x2d7   :  { %609 = vsyncpa [#allocation3 + $0x1], 1 }

</bundles_post_ra>
